<compile_context>
chip_gen: v5e
topology: v5e:2x2
jax: 0.10.0
libtpu: 0.0.40
codegen_flags: <defaults>
</compile_context>

<pallas_src>
import functools

import jax
import jax.numpy as jnp
from jax import lax
from jax.experimental import pallas as pl
from jax.experimental.pallas import tpu as pltpu

SAMPLES = 64  # matches `samples = 64` in the PyTorch forward


def _vmem_limit_bytes() -> int:
    """Generation-aware scoped-VMEM request: min(48 MiB, 0.6 * physical VMEM)."""
    try:
        cap = int(pltpu.get_tpu_info().vmem_capacity_bytes)
    except Exception:  # emulator / older jax: fall back to the tightest chip (v7x)
        cap = 64 * 1024 * 1024
    return int(min(48 * 1024 * 1024, 0.6 * cap))


def _pick_block_b(B: int, C: int, S: int, budget_bytes: int, keep_pred: bool) -> int:
    """Pick a batch tile that (a) is legal for lowering (multiple of 8, or == B),
    (b) keeps the double-buffered working set under the VMEM budget, (c) keeps
    the grid >= 4 steps so the DMA/compute pipeline stays busy and both v7x
    TensorCores get work, and (d) keeps per-step HBM traffic >= ~2 MiB so the
    ~0.35 us per-step overhead is amortized (when B is large enough)."""
    f32 = 4
    big_bufs = 2 + (2 if keep_pred else 0)           # double-buffered (TB, C, S) DMA bufs
    per_row_vmem = C * S * f32 * (big_bufs + 2)      # + live f32 temporaries (pred, e)
    cap = max(1, budget_bytes // per_row_vmem)

    legal = sorted({d for d in range(8, B + 1, 8) if B % d == 0} | {B})
    fitting = [d for d in legal if d <= cap] or [legal[0]]

    min_grid = 4                                     # >= max(4, 2 * num TensorCores)
    min_step_bytes = 2 * 1024 * 1024
    step_bytes = lambda d: d * C * S * f32 * (2 if keep_pred else 1)

    good = [d for d in fitting if B // d >= min_grid and step_bytes(d) >= min_step_bytes]
    if good:
        return max(good)
    pipelined = [d for d in fitting if B // d >= min_grid]
    if pipelined:
        return max(pipelined)
    return max(fitting)


def _vi_loss_math(mean, var, tgt, normals, pred_ref, nll_ref):
    """Shared per-tile math. mean/var: (TB, C) f32; tgt: (TB, 1) i32;
    normals: (TB, C, S) f32."""
    # prediction = mean + sqrt(variance) * normals   (broadcast over samples)
    pred = mean[:, :, None] + jnp.sqrt(var)[:, :, None] * normals          # (TB, C, S)
    if pred_ref is not None:
        pred_ref[...] = pred.astype(pred_ref.dtype)

    # Numerically-stable softmax statistics over the class axis, per sample.
    m = jnp.max(pred, axis=1, keepdims=True)                               # (TB, 1, S)
    e = jnp.exp(pred - m)                                                  # (TB, C, S)
    denom = jnp.sum(e, axis=1, keepdims=True)                              # (TB, 1, S)

    # Target-class numerator via an in-kernel iota mask (no one-hot HBM stream).
    cls = lax.broadcasted_iota(jnp.int32, mean.shape, 1)                   # (TB, C)
    mask = (cls == tgt).astype(jnp.float32)                                # (TB, C)
    e_t = jnp.sum(e * mask[:, :, None], axis=1, keepdims=True)             # (TB, 1, S)

    # p_t[b] = mean_s softmax(pred)[b, target[b], s]; only divide is (TB,1,S).
    p_t = jnp.mean(e_t / denom, axis=2)                                    # (TB, 1)
    nll_ref[...] = -jnp.log(p_t)


def _kernel_with_pred(mv_ref, tgt_ref, normals_ref, pred_ref, nll_ref):
    mv = mv_ref[...].astype(jnp.float32)                                   # (2, TB, C)
    _vi_loss_math(mv[0], mv[1], tgt_ref[...],
                  normals_ref[...].astype(jnp.float32), pred_ref, nll_ref)


def _kernel_no_pred(mv_ref, tgt_ref, normals_ref, nll_ref):
    mv = mv_ref[...].astype(jnp.float32)
    _vi_loss_math(mv[0], mv[1], tgt_ref[...],
                  normals_ref[...].astype(jnp.float32), None, nll_ref)


def _make_prng_kernel(samples: int, keep_pred: bool):
    """Kernel variant drawing the standard normals on-chip (no HBM normals
    stream).  Opt-in: the RNG stream differs from torch Normal(0,1).sample()."""
    def kernel(seed_ref, mv_ref, tgt_ref, *out_refs):
        mv = mv_ref[...].astype(jnp.float32)                               # (2, TB, C)
        tb, c = mv.shape[1], mv.shape[2]
        pltpu.prng_seed(seed_ref[0] + pl.program_id(0))   # distinct stream per tile
        normals = pltpu.stateful_normal((tb, c, samples), jnp.float32)
        pred_ref = out_refs[0] if keep_pred else None
        _vi_loss_math(mv[0], mv[1], tgt_ref[...], normals, pred_ref, out_refs[-1])
    return kernel


@functools.partial(
    jax.jit,
    static_argnames=("block_b", "return_prediction", "prediction_dtype",
                     "use_tpu_prng", "samples"))
def classification_loss_vi(prediction_mean, prediction_variance, target,
                           kl_div_value, normals=None, prng_seed=None, *,
                           block_b=None, return_prediction=True,
                           prediction_dtype=None, use_tpu_prng=False,
                           samples=SAMPLES):
    """JAX/Pallas equivalent of ClassificationLossVI.forward (training branch)."""
    B, C = prediction_mean.shape
    if use_tpu_prng:
        S = int(samples)
    else:
        if normals is None:
            raise ValueError("pass `normals` or set use_tpu_prng=True")
        S = normals.shape[-1]

    out_dtype = prediction_mean.dtype if prediction_dtype is None else prediction_dtype

    vmem_limit = _vmem_limit_bytes()
    if block_b is None:
        block_b = _pick_block_b(B, C, S, int(0.8 * vmem_limit), return_prediction)
    assert B % block_b == 0, "batch tile must divide the batch"
    assert block_b % 8 == 0 or block_b == B, "batch tile must be 8-aligned or full"
    grid = (B // block_b,)

    # Fuse the two tiny (B, C) operands into one DMA stream; pass the target as
    # a tiny (B, 1) int32 column instead of a (B, C) one-hot.
    mv = jnp.stack([prediction_mean, prediction_variance])                 # (2, B, C)
    tgt = target.astype(jnp.int32).reshape(B, 1)

    mv_spec = pl.BlockSpec((2, block_b, C), lambda i: (0, i, 0))
    tgt_spec = pl.BlockSpec((block_b, 1), lambda i: (i, 0))
    bcs_spec = pl.BlockSpec((block_b, C, S), lambda i: (i, 0, 0))
    nll_spec = pl.BlockSpec((block_b, 1), lambda i: (i, 0))
    # TODO(synk): with S=64 the last dim fills half a vreg; folding two classes
    # per lane row (view (B, C//2, 2S), sublane reduce + pltpu.roll combine)
    # removes masked stores, but only pays once the big HBM streams are gone.

    out_specs, out_shape = [], []
    if return_prediction:
        out_specs.append(bcs_spec)
        out_shape.append(jax.ShapeDtypeStruct((B, C, S), out_dtype))
    out_specs.append(nll_spec)
    out_shape.append(jax.ShapeDtypeStruct((B, 1), jnp.float32))

    compiler_params = pltpu.CompilerParams(
        dimension_semantics=("parallel",),   # independent batch tiles -> megacore
        vmem_limit_bytes=vmem_limit)

    if use_tpu_prng:
        seed = (jnp.zeros((), jnp.int32) if prng_seed is None
                else jnp.asarray(prng_seed, jnp.int32)).reshape(1)
        outs = pl.pallas_call(
            _make_prng_kernel(S, return_prediction),
            grid=grid,
            in_specs=[pl.BlockSpec(memory_space=pltpu.MemorySpace.SMEM),
                      mv_spec, tgt_spec],
            out_specs=out_specs,
            out_shape=out_shape,
            compiler_params=compiler_params,
        )(seed, mv, tgt)
    else:
        kernel = _kernel_with_pred if return_prediction else _kernel_no_pred
        outs = pl.pallas_call(
            kernel,
            grid=grid,
            in_specs=[mv_spec, tgt_spec, bcs_spec],
            out_specs=out_specs,
            out_shape=out_shape,
            compiler_params=compiler_params,
        )(mv, tgt, normals)

    nll = outs[-1]
    xe = jnp.mean(nll)                        # mean over batch
    losses = {"xe": xe, "total_loss": xe + kl_div_value}   # kl_div() is a scalar here
    if return_prediction:
        losses["prediction"] = outs[0]
    return losses


def _reference(prediction_mean, prediction_variance, normals, target, kl_div_value):
    """Pure-JAX reference mirroring the PyTorch forward (training branch)."""
    pred = (prediction_mean[:, :, None]
            + jnp.sqrt(prediction_variance)[:, :, None] * normals)
    p = jax.nn.softmax(pred, axis=1).mean(axis=2)
    xe = -jnp.log(p[jnp.arange(p.shape[0]), target.astype(jnp.int32)]).mean()
    return {"prediction": pred, "xe": xe, "total_loss": xe + kl_div_value}


if __name__ == "__main__":
    key = jax.random.PRNGKey(0)
    k_mean, k_var, k_normals, k_tgt = jax.random.split(key, 4)

    B, C, S = 32, 16, SAMPLES
    prediction_mean = jax.random.normal(k_mean, (B, C), dtype=jnp.float32)
    prediction_variance = jax.nn.softplus(
        jax.random.normal(k_var, (B, C), dtype=jnp.float32)) + 1e-3   # variance > 0
    # torch.distributions.Normal(0,1).sample() -> explicit standard normals here
    # so the kernel is deterministic and verifiable against the reference.
    normals = jax.random.normal(k_normals, (B, C, S), dtype=jnp.float32)
    target = jax.random.randint(k_tgt, (B,), 0, C, dtype=jnp.int32)
    # TODO(synk): output_dict['kl_div'] is a callable in the PyTorch module;
    # here it is a deterministic synthetic scalar added in the wrapper.
    kl_div_value = jnp.float32(0.01)

    ref = _reference(prediction_mean, prediction_variance, normals, target,
                     kl_div_value)

    # Full forward (prediction kept). Auto tile heuristic -> block_b=8, grid=(4,),
    # exercising the pipelined / megacore-parallel path even at this small size.
    losses = classification_loss_vi(prediction_mean, prediction_variance,
                                    target, kl_div_value, normals=normals)
    jax.block_until_ready(losses)
    assert jnp.allclose(losses["prediction"], ref["prediction"], atol=1e-5, rtol=1e-5)
    assert jnp.allclose(losses["xe"], ref["xe"], atol=1e-5, rtol=1e-5)
    assert jnp.allclose(losses["total_loss"], ref["total_loss"], atol=1e-5, rtol=1e-5)

    # Loss-only variant: the (B, C, S) prediction writeback is dropped entirely
    # (halves HBM traffic for callers that only need xe / total_loss).
    lite = classification_loss_vi(prediction_mean, prediction_variance, target,
                                  kl_div_value, normals=normals,
                                  return_prediction=False)
    jax.block_until_ready(lite)
    assert "prediction" not in lite
    assert jnp.allclose(lite["xe"], ref["xe"], atol=1e-5, rtol=1e-5)
    assert jnp.allclose(lite["total_loss"], ref["total_loss"], atol=1e-5, rtol=1e-5)

    print("KERNEL_OK")
</pallas_src>

<mosaic_0001>
module attributes {stable_mosaic.version = 11 : i64} {
  func.func @_kernel_with_pred(%arg0: i32, %arg1: memref<2x8x16xf32, #tpu.memory_space<vmem>>, %arg2: memref<8x1xi32, #tpu.memory_space<vmem>>, %arg3: memref<8x16x64xf32, #tpu.memory_space<vmem>>, %arg4: memref<8x16x64xf32, #tpu.memory_space<vmem>>, %arg5: memref<8x1xf32, #tpu.memory_space<vmem>>) attributes {dimension_semantics = [#tpu.dimension_semantics<parallel>], iteration_bounds = array<i64: 4>, scalar_prefetch = 0 : i64, scratch_operands = 0 : i64, tpu.core_type = #tpu.core_type<tc>, window_params = [{transform_indices = @transform_0, window_bounds = array<i64: 2, 8, 16>}, {transform_indices = @transform_1, window_bounds = array<i64: 8, 1>}, {transform_indices = @transform_2, window_bounds = array<i64: 8, 16, 64>}, {transform_indices = @transform_3, window_bounds = array<i64: 8, 16, 64>}, {transform_indices = @transform_4, window_bounds = array<i64: 8, 1>}]} {
    %c0 = arith.constant 0 : index
    %c0_0 = arith.constant 0 : index
    %c0_1 = arith.constant 0 : index
    %0 = vector.load %arg1[%c0, %c0_0, %c0_1] : memref<2x8x16xf32, #tpu.memory_space<vmem>>, vector<2x8x16xf32>
    %1 = vector.extract_strided_slice %0 {offsets = [0, 0, 0], sizes = [1, 8, 16], strides = [1, 1, 1]} : vector<2x8x16xf32> to vector<1x8x16xf32>
    %2 = vector.shape_cast %1 : vector<1x8x16xf32> to vector<8x16xf32>
    %3 = vector.extract_strided_slice %0 {offsets = [1, 0, 0], sizes = [1, 8, 16], strides = [1, 1, 1]} : vector<2x8x16xf32> to vector<1x8x16xf32>
    %4 = vector.shape_cast %3 : vector<1x8x16xf32> to vector<8x16xf32>
    %c0_2 = arith.constant 0 : index
    %c0_3 = arith.constant 0 : index
    %5 = vector.load %arg2[%c0_2, %c0_3] : memref<8x1xi32, #tpu.memory_space<vmem>>, vector<8x1xi32>
    %c0_4 = arith.constant 0 : index
    %c0_5 = arith.constant 0 : index
    %c0_6 = arith.constant 0 : index
    %6 = vector.load %arg3[%c0_4, %c0_5, %c0_6] : memref<8x16x64xf32, #tpu.memory_space<vmem>>, vector<8x16x64xf32>
    %7 = vector.shape_cast %2 : vector<8x16xf32> to vector<8x16x1xf32>
    %8 = math.sqrt %4 : vector<8x16xf32>
    %9 = vector.shape_cast %8 : vector<8x16xf32> to vector<8x16x1xf32>
    %10 = vector.broadcast %9 : vector<8x16x1xf32> to vector<8x16x64xf32>
    %11 = arith.mulf %10, %6 : vector<8x16x64xf32>
    %12 = vector.broadcast %7 : vector<8x16x1xf32> to vector<8x16x64xf32>
    %13 = arith.addf %12, %11 : vector<8x16x64xf32>
    %c0_7 = arith.constant 0 : index
    %c0_8 = arith.constant 0 : index
    %c0_9 = arith.constant 0 : index
    %14 = vector.load %arg4[%c0_7, %c0_8, %c0_9] : memref<8x16x64xf32, #tpu.memory_space<vmem>>, vector<8x16x64xf32>
    tpu.vector_store %arg4[%c0_7, %c0_8, %c0_9], %13 {strides = array<i32>} : memref<8x16x64xf32, #tpu.memory_space<vmem>>, vector<8x16x64xf32>,
    %cst = arith.constant dense<0xFF800000> : vector<8x64xf32>
    %15 = vector.multi_reduction <maximumf>, %13, %cst [1] : vector<8x16x64xf32> to vector<8x64xf32>
    %16 = vector.shape_cast %15 : vector<8x64xf32> to vector<8x1x64xf32>
    %17 = vector.broadcast %16 : vector<8x1x64xf32> to vector<8x16x64xf32>
    %18 = arith.subf %13, %17 : vector<8x16x64xf32>
    %19 = math.exp %18 : vector<8x16x64xf32>
    %cst_10 = arith.constant dense<0.000000e+00> : vector<8x64xf32>
    %20 = vector.multi_reduction <add>, %19, %cst_10 [1] : vector<8x16x64xf32> to vector<8x64xf32>
    %21 = vector.shape_cast %20 : vector<8x64xf32> to vector<8x1x64xf32>
    %22 = tpu.iota {dimensions = array<i32: 1>} : vector<8x16xi32>
    %23 = vector.broadcast %5 : vector<8x1xi32> to vector<8x16xi32>
    %24 = arith.cmpi eq, %22, %23 : vector<8x16xi32>
    %25 = arith.extui %24 : vector<8x16xi1> to vector<8x16xi32>
    %26 = arith.sitofp %25 : vector<8x16xi32> to vector<8x16xf32>
    %27 = vector.shape_cast %26 : vector<8x16xf32> to vector<8x16x1xf32>
    %28 = vector.broadcast %27 : vector<8x16x1xf32> to vector<8x16x64xf32>
    %29 = arith.mulf %19, %28 : vector<8x16x64xf32>
    %cst_11 = arith.constant dense<0.000000e+00> : vector<8x64xf32>
    %30 = vector.multi_reduction <add>, %29, %cst_11 [1] : vector<8x16x64xf32> to vector<8x64xf32>
    %31 = vector.shape_cast %30 : vector<8x64xf32> to vector<8x1x64xf32>
    %32 = arith.divf %31, %21 : vector<8x1x64xf32>
    %cst_12 = arith.constant dense<0.000000e+00> : vector<8x1xf32>
    %33 = vector.multi_reduction <add>, %32, %cst_12 [2] : vector<8x1x64xf32> to vector<8x1xf32>
    %cst_13 = arith.constant 6.400000e+01 : f32
    %34 = vector.broadcast %cst_13 : f32 to vector<8x1xf32>
    %35 = arith.divf %33, %34 : vector<8x1xf32>
    %36 = math.log %35 : vector<8x1xf32>
    %cst_14 = arith.constant 0.000000e+00 : f32
    %37 = vector.broadcast %cst_14 : f32 to vector<8x1xf32>
    %38 = arith.subf %37, %36 : vector<8x1xf32>
    %c0_15 = arith.constant 0 : index
    %c0_16 = arith.constant 0 : index
    %39 = vector.load %arg5[%c0_15, %c0_16] : memref<8x1xf32, #tpu.memory_space<vmem>>, vector<8x1xf32>
    tpu.vector_store %arg5[%c0_15, %c0_16], %38 {strides = array<i32>} : memref<8x1xf32, #tpu.memory_space<vmem>>, vector<8x1xf32>,
    return
  }
  func.func @transform_0(%arg0: i32) -> (i32, i32, i32) {
    %c0_i32 = arith.constant 0 : i32
    %c0_i32_0 = arith.constant 0 : i32
    %c0_i32_1 = arith.constant 0 : i32
    return %c0_i32, %arg0, %c0_i32_0 : i32, i32, i32
  }
  func.func @transform_1(%arg0: i32) -> (i32, i32) {
    %c0_i32 = arith.constant 0 : i32
    %c0_i32_0 = arith.constant 0 : i32
    return %arg0, %c0_i32 : i32, i32
  }
  func.func @transform_2(%arg0: i32) -> (i32, i32, i32) {
    %c0_i32 = arith.constant 0 : i32
    %c0_i32_0 = arith.constant 0 : i32
    %c0_i32_1 = arith.constant 0 : i32
    return %arg0, %c0_i32, %c0_i32_0 : i32, i32, i32
  }
  func.func @transform_3(%arg0: i32) -> (i32, i32, i32) {
    %c0_i32 = arith.constant 0 : i32
    %c0_i32_0 = arith.constant 0 : i32
    %c0_i32_1 = arith.constant 0 : i32
    return %arg0, %c0_i32, %c0_i32_0 : i32, i32, i32
  }
  func.func @transform_4(%arg0: i32) -> (i32, i32) {
    %c0_i32 = arith.constant 0 : i32
    %c0_i32_0 = arith.constant 0 : i32
    return %arg0, %c0_i32 : i32, i32
  }
}

</mosaic_0001>

<bundles_post_ra>
// kernel: classification_loss_vi.1
= control target key start
LH: loop header
LB: loop body
LE: loop exit
PB: predicated region body
PF: predicated region fallthrough
CT: control target
= control target key end

     0   :  { %s2370_s0 = inlined_call_operand.vmem [shape: f32[2,32,16], index: 0, kind: input, shape index: {}]   ;;  %s2371_s1 = inlined_call_operand.vmem [shape: s32[32,1], index: 1, kind: input, shape index: {}]   ;;  %s2372_s2 = inlined_call_operand.hbm [shape: f32[32,16,64], index: 2, kind: input, shape index: {}]   ;;  %s2373_s3 = inlined_call_operand.hbm [shape: f32[32,16,64], index: 3, kind: output, shape index: {0}]   ;;  %s2374_s4 = inlined_call_operand.vmem [shape: f32[32,1], index: 4, kind: output, shape index: {1}]  }
   0x1   :  { %2375 = sst [smem:[#allocation9_spill]] %s2370_s0 }
   0x2   :  { %10 = vsyncpa [#allocation4], 0 }
   0x3   :  { %12 = vsyncpa [#allocation4 + $0x1], 0 }
   0x4   :  { %13 = vsyncpa [#allocation5], 0 }
   0x5   :  { %15 = vsyncpa [#allocation5 + $0x1], 0  ;;  %s1679_s15 = smov 0   ;;  %s1681_s16 = smov 0  }
   0x6   :  { %s1683_s17 = smov 0   ;;  %s1685_s18 = smov 0  }
   0x7 LB: > { %s1700_s19 = sadd.s32 4294967295, %s1645_s18   ;;  %s1347_s20 = sadd.s32 4294967294, %s1645_s18   ;;  %s1645_s18 = sphi %s1685_s18, %s2410_s18   ;;  %s1641_s17 = sphi %s1683_s17, %s2409_s17   ;;  %s1637_s16 = sphi %s1681_s16, %s2408_s16   ;;  %s1633_s15 = sphi %s1679_s15, %s2407_s15  }
   0x8   : > { %s1704_s21 = sadd.s32 1, %s1645_s18   ;;  %s28_s22 = sadd.s32 1, %s1641_s17 }
   0x9   : > { %s25_s23 = ssub.s32 %s1645_s18, %s1704_s21  ;;  %p35_p0 = scmp.ne.s32.totalorder %s1641_s17, %s1637_s16 }
   0xa   : > { %p26_p1 = scmp.eq.s32.totalorder %s25_s23, 0  ;;  %p36_p2 = scmp.eq.s32.totalorder %s1645_s18, 0 }
   0xb   : > { %p93_p3 = scmp.ne.s32.totalorder %s1637_s16, %s1633_s15  ;;  %p94_p4 = scmp.eq.s32.totalorder %s1700_s19, 0 }
   0xc   : > { %s1716_s24 = scalar_select %p26_p1, %s1641_s17, %s28_s22  }
   0xd   : > { %p1718_p5 = por %p36_p2, %p35_p0  ;;  %p1722_p6 = por %p94_p4, %p93_p3 }
   0xe   : > { %p117_p7 = scmp.eq.s32.totalorder %s1700_s19, 3  ;;  %p123_p8 = scmp.eq.s32.totalorder %s1347_s20, 3 }
   0xf   : > { %p1349_p11 = scmp.ge.s32.totalorder %s1645_s18, 4 }
  0x10   : > { %p1727_p9 = por %p117_p7, %p35_p0  ;;  %p1731_p10 = por %p123_p8, %p93_p3 }
  0x11   : > { %165 = sbr.rel (%p1349_p11) target bundleno = 51 (0x33), region = 16 }
  0x16   : > { %168 = sbr.rel (!%p1718_p5) target bundleno = 34 (0x22), region = 20  ;;  %s170_s29 = sand.u32 (%p1718_p5), 1, %s1641_s17  }
  0x17   : > { %s1351_s30 = sshll.u32 (%p1718_p5), %s1645_s18, 3  ;;  %s1350_s5 = sshll.u32 (%p1718_p5), %s170_s29, 4 }
  0x18   : > { %s2380_s0 = sld [smem:[#allocation9_spill]] (%p1718_p5)  ;;  %s172_s9 = scalar_lea.vmem (%p1718_p5), [#allocation2], %s1350_s5 }
  0x1e   : > { %s174_s8 = scalar_lea.vmem %s2380_s0, %s1351_s30 }
  0x1f   : > { %v205_v0 = vld [vmem:[%s174_s8] sm:$0xff] }
  0x20   : > { %v207_v1 = vld [vmem:[%s174_s8 + $0x20] sm:$0xff]  ;;  %206 = vst [vmem:[%s172_s9] sm:$0xff] %v205_v0 }
  0x21   : > { %208 = vst [vmem:[%s172_s9 + $0x8] sm:$0xff] %v207_v1 }
  0x22 PF: > { %s222_s10 = sand.u32 1, %s1641_s17   ;;  %s1370_s11 = sshll.u32 %s1645_s18, 7 }
  0x23   : > { %s1352_s12 = sshll.u32 %s222_s10, 7  ;;  %s232_s20 = scalar_lea.hbm %s2372_s2, %s1370_s11 }
  0x24   : > { %s233_s22 = sshll.u32 %s232_s20, 4  ;;  %s226_s23 = scalar_lea.vmem [#allocation3], %s1352_s12  ;;  %s234_s22 = int_to_ptr.hbm [resolvable:$true] %s233_s22 }
  0x25   : > { %s235_s29 = sshll.u32 %s226_s23, 4  ;;  %s223_s30 = scalar_lea.sflag [#allocation4], %s222_s10  ;;  %s236_s29 = int_to_ptr.vmem [resolvable:$true] %s235_s29 }
  0x26   : > { %s1551_s5 = sshra.s32 %s234_s22, 4  ;;  %s1557_s9 = scalar_lea.hbm %s2372_s2, 512  ;;  %s1552_s5 = int_to_ptr.hbm [resolvable:$true] %s1551_s5 }
  0x27   : > { %s1553_s6 = scalar_lea.hbm %s1552_s5, 128  ;;  %p1558_p1 = scmp.lt.s32.totalorder %s1552_s5, %s2372_s2 }
  0x28   : > { %p1554_p12 = scmp.ne.s32.totalorder %s1552_s5, %s1553_s6  ;;  %p1559_p2 = scmp.lt.s32.totalorder %s1557_s9, %s1553_s6 }
  0x2a   : > { %p1555_p13 = pnand %p1554_p12, %p1718_p5  ;;  %p1560_p3 = por %p1559_p2, %p1558_p1 }
  0x2c   : > { %p1556_p0 = pneg %p1555_p13 }
  0x2e   : > { %p1561_p4 = pnand %p1560_p3, %p1556_p0 }
  0x30   : > { %1564 = shalt.err (!%p1561_p4)
}
  0x31   : > { %s1647_s10 = smov 128   ;;  %s1648_s11 = smov 8  }
  0x32   : > { %1373 = dma.hbm_to_vmem [thread:$0]  (%p1718_p5), %s234_s22, 2048, %s236_s29, %s223_s30, %s1647_s10, %s1647_s10, %s1648_s11  }
  0x33 PF: > { %p1356_p7 = scmp.ge.s32.totalorder %s1645_s18, 1  ;;  %p243_p8 = scmp.lt.s32.totalorder %s1645_s18, 5 }
  0x35   : > { %p244_p11 = pnand %p1356_p7, %p243_p8 }
  0x36   : > { %s1761_s0 = sand.u32 (!%p244_p11), 1, %s1637_s16  }
  0x37   : > { %247 = sbr.rel (%p244_p11) target bundleno = 545 (0x221), region = 66  ;;  %s1357_s12 = sshll.u32 (!%p244_p11), %s1761_s0, 4 }
  0x38   : > { %s1358_s14 = sshll.u32 (!%p244_p11), %s1761_s0, 7  ;;  %s252_s20 = scalar_lea.vmem (!%p244_p11), [#allocation2], %s1357_s12 }
  0x39   : > { %s257_s25 = scalar_lea.sflag (!%p244_p11), [#allocation4], %s1761_s0  ;;  %s1768_s22 = scalar_lea.vmem (!%p244_p11), [#allocation3], %s1358_s14 }
  0x3c   : > { %1624 = dma.done.wait (%p1722_p6), %s257_s25, 2048  }
  0x3d   : > { %1626 = vsyncadd (%p1722_p6), %s257_s25, 4294965248  ;;  %v328_v2 = vlaneseq  ;;  %v308_v4 = vld [vmem:[%s252_s20] sm:$0xff]  ;;  %v309_v5 = vld [vmem:[%s252_s20 + $0x8] sm:$0xff]  ;;  %p298_p5 = scmp.lt.s32.totalorder %s1700_s19, 3  ;;  %v1649_v27 = vmov 0   ;;  %vm579_vm2 = vcmask 523264  }
  0x3e   : > { %v353_v6 = vperm.slane %v308_v4, 2  ;;  %v340_v7 = vperm.slane %v308_v4, 1  ;;  %v327_v8 = vperm.slane %v308_v4, 0  ;;  %1483 = vrsqrt.f32 %v309_v5  ;;  %v313_v39 = vld [vmem:[%s1768_s22 + $0x10] sm:$0xff]  ;;  %s1829_s6 = scalar_lea.vmem [#allocation6], %s1358_s14  ;;  %v312_v52 = vld [vmem:[%s1768_s22 + $0x8] sm:$0xff] }
  0x3f   : > { %v1775_v3 = vshrl.u32 %v328_v2, 7  ;;  %v379_v12 = vperm.slane %v308_v4, 4  ;;  %vm438_vm0 = vcmp.eq.f32.partialorder %v309_v5, inf  ;;  %v441_v17 = vand.u32 2147483648, %v309_v5  ;;  %s1795_s26 = scalar_select %p298_p5, %s1700_s19, 3  ;;  %v318_v55 = vld [vmem:[%s1768_s22 + $0x38] sm:$0xff] }
  0x40   : > { %vm440_vm1 = vcmp.eq.f32.partialorder %v309_v5, 0.0  ;;  %v366_v22 = vperm.slane %v308_v4, 3  ;;  %v392_v23 = vperm.slane %v308_v4, 5  ;;  %v405_v24 = vperm.slane %v308_v4, 6  ;;  %v315_v63 = vld [vmem:[%s1768_s22 + $0x20] sm:$0xff]  ;;  %s1372_s7 = sshll.u32 %s1700_s19, 7 }
  0x41   : > { %1423 = vset.pattern.permute.xlu2 %v1775_v3  ;;  %1422 = vset.pattern.permute.xlu1 %v1775_v3  ;;  %v1781_v10 = vadd.s32 8, %v1775_v3  ;;  %s1360_s23 = sshll.u32 %s1795_s26, 3  ;;  %v418_v28 = vperm.slane %v308_v4, 7  ;;  %v789_v61 = vand.u32 127, %v328_v2  ;;  %v1650_v1 = vmov 0.0   ;;  %v317_v2 = vld [vmem:[%s1768_s22 + $0x30] sm:$0xff]  ;;  %s1213_s13 = scalar_lea.hbm %s2373_s3, %s1372_s7 }
  0x42   : > { %1421 = vset.pattern.permute.xlu0 %v1775_v3  ;;  %s301_s5 = scalar_lea.vmem %s2371_s1, %s1360_s23  ;;  %s1214_s10 = sshll.u32 %s1829_s6, 4  ;;  %s1215_s10 = int_to_ptr.vmem [resolvable:$true] %s1214_s10 }
  0x43   : > { %v310_v26 = vld [vmem:[%s301_s5] sm:$0xff]  ;;  %s1216_s11 = sshll.u32 %s1213_s13, 4  ;;  %s1197_s12 = scalar_lea.sflag [#allocation5], %s1761_s0  ;;  %s1217_s11 = int_to_ptr.hbm [resolvable:$true] %s1216_s11 }
  0x44   : > { %v1484_v9 = vpop.eup %1483  ;;  %s1593_s14 = sshra.s32 %s1217_s11, 4  ;;  %s1599_s19 = scalar_lea.hbm %s2373_s3, 512  ;;  %s1594_s14 = int_to_ptr.hbm [resolvable:$true] %s1593_s14 }
  0x45   : > { %v432_v11 = vmul.f32 %v1484_v9, %v309_v5  ;;  %s1595_s20 = scalar_lea.hbm %s1594_s14, 128  ;;  %p1600_p0 = scmp.lt.s32.totalorder %s1594_s14, %s2373_s3 }
  0x46   : > { %p1596_p6 = scmp.ne.s32.totalorder %s1594_s14, %s1595_s20  ;;  %p1601_p1 = scmp.lt.s32.totalorder %s1599_s19, %s1595_s20 }
  0x47   : > { %v433_v13 = vmul.f32 %v1484_v9, %v432_v11 }
  0x48   : > { %p1597_p12 = pnand %p1596_p6, %p1727_p9  ;;  %p1602_p2 = por %p1601_p1, %p1600_p0 }
  0x49   : > { %358 = vperm.xlu2 %1423, %v353_v6   ;;  %345 = vperm.xlu1 %1422, %v340_v7   ;;  %v434_v14 = vmul.f32 0.5, %v433_v13 }
  0x4a   : > { %332 = vperm.xlu0 %1421, %v327_v8   ;;  %p1598_p13 = pneg %p1597_p12 }
  0x4b   : > { %v435_v15 = vsub.f32 1.5, %v434_v14 }
  0x4c   : > { %p1603_p3 = pnand %p1602_p2, %p1598_p13 }
  0x4d   : > { %v436_v16 = vmul.f32 %v1484_v9, %v435_v15 }
  0x4f   : > { %v437_v18 = vmul.f32 %v436_v16, %v309_v5 }
  0x51   : > { %1426 = vset.pattern.permute.xlu2 %v1781_v10  ;;  %1424 = vset.pattern.permute.xlu1 %v1781_v10  ;;  %v439_v19 = vsel %vm438_vm0, %v309_v5, %v437_v18 }
  0x52   : > { %384 = vperm.xlu0 %1421, %v379_v12   ;;  %v1785_v20 = vsel %vm440_vm1, %v441_v17, %v439_v19 }
  0x53   : > { %v456_v21 = vperm.slane %v1785_v20, 1  ;;  %v482_v25 = vperm.slane %v1785_v20, 3  ;;  %v443_v29 = vperm.slane %v1785_v20, 0  ;;  %v469_v30 = vperm.slane %v1785_v20, 2 }
  0x54   : > { %v495_v32 = vperm.slane %v1785_v20, 4  ;;  %v508_v35 = vperm.slane %v1785_v20, 5  ;;  %v521_v36 = vperm.slane %v1785_v20, 6  ;;  %v534_v40 = vperm.slane %v1785_v20, 7 }
  0x59   : > { %364 = vperm.xlu2 %1426, %v353_v6   ;;  %351 = vperm.xlu1 %1424, %v340_v7  }
  0x5a   : > { %461 = vperm.xlu0 %1421, %v456_v21  }
  0x61   : > { %377 = vperm.xlu2 %1426, %v366_v22   ;;  %1425 = vset.pattern.permute.xlu1 %v1775_v3 }
  0x62   : > { %1431 = vset.pattern.permute.xlu0 %v1781_v10 }
  0x69   : > { %1428 = vset.pattern.permute.xlu2 %v1775_v3  ;;  %371 = vperm.xlu1 %1425, %v366_v22  }
  0x6a   : > { %338 = vperm.xlu0 %1431, %v327_v8  }
  0x71   : > { %397 = vperm.xlu2 %1428, %v392_v23   ;;  %1427 = vset.pattern.permute.xlu1 %v1781_v10 }
  0x72   : > { %416 = vperm.xlu0 %1431, %v405_v24  }
  0x79   : > { %410 = vperm.xlu2 %1428, %v405_v24   ;;  %390 = vperm.xlu1 %1427, %v379_v12  }
  0x7a   : > { %493 = vperm.xlu0 %1431, %v482_v25  }
  0x81   : > { %1430 = vset.pattern.permute.xlu2 %v1781_v10  ;;  %403 = vperm.xlu1 %1427, %v392_v23  }
  0x82   : > { %1436 = vset.pattern.permute.xlu0 %v1649_v27 }
  0x83   : > { %791 = vperm.xlu0 %1436, %v310_v26  }
  0x89   : > { %429 = vperm.xlu2 %1430, %v418_v28   ;;  %1429 = vset.pattern.permute.xlu1 %v1775_v3 }
  0x8b   : > { %1437 = vset.pattern.permute.xlu0 %v1775_v3 }
  0x91   : > { %454 = vperm.xlu2 %1430, %v443_v29   ;;  %423 = vperm.xlu1 %1429, %v418_v28  }
  0x99   : > { %1433 = vset.pattern.permute.xlu2 %v1775_v3  ;;  %448 = vperm.xlu1 %1429, %v443_v29  }
  0xa1   : > { %474 = vperm.xlu2 %1433, %v469_v30   ;;  %1432 = vset.pattern.permute.xlu1 %v1781_v10 }
  0xa3   : > { %v359_v31 = vpop.permute.xlu2 %358 }
  0xa9   : > { %487 = vperm.xlu2 %1433, %v482_v25   ;;  %467 = vperm.xlu1 %1432, %v456_v21   ;;  %v311_v25 = vld [vmem:[%s1768_s22] sm:$0xff] }
  0xb1   : > { %1435 = vset.pattern.permute.xlu2 %v1781_v10  ;;  %480 = vperm.xlu1 %1432, %v469_v30  }
  0xb3   : > { %v1813_v33 = vpop.permute.xlu2 %364 }
  0xb9   : > { %506 = vperm.xlu2 %1435, %v495_v32   ;;  %1434 = vset.pattern.permute.xlu1 %v1775_v3 }
  0xbb   : > { %v378_v37 = vpop.permute.xlu2 %377  ;;  %v346_v44 = vpop.permute.xlu1 %345 }
  0xbc   : > { %v1815_v34 = vpop.permute.xlu0 %332 }
  0xc1   : > { %519 = vperm.xlu2 %1435, %v508_v35   ;;  %500 = vperm.xlu1 %1434, %v495_v32  }
  0xc4   : > { %v1819_v38 = vpop.permute.xlu0 %384 }
  0xc9   : > { %532 = vperm.xlu2 %1435, %v521_v36   ;;  %513 = vperm.xlu1 %1434, %v508_v35  }
  0xcb   : > { %v1823_v42 = vpop.permute.xlu2 %397  ;;  %v1837_v47 = vpop.permute.xlu1 %351 }
  0xcc   : > { %v462_v41 = vpop.permute.xlu0 %461 }
  0xcd   : > { %v549_v43 = vmul.f32 %v462_v41, %v313_v39  ;;  %v320_v39 = vld [vmem:[%s1768_s22 + $0x48] sm:$0xff] }
  0xcf   : > { %v1825_v45 = vadd.f32 %v549_v43, %v346_v44 }
  0xd1   : > { %545 = vperm.xlu2 %1435, %v534_v40   ;;  %526 = vperm.xlu1 %1434, %v521_v36   ;;  %582 = vst.msk [vmem:[%s1829_s6 + $0x10] sm:$0xff] %vm579_vm2, %v1825_v45 }
  0xd3   : > { %v1834_v46 = vpop.permute.xlu2 %410 }
  0xd9   : > { %539 = vperm.xlu1 %1434, %v534_v40   ;;  %1449 = vset.pattern.permute.xlu2 %v1775_v3 }
  0xdb   : > { %v372_v50 = vpop.permute.xlu1 %371 }
  0xdc   : > { %v339_v48 = vpop.permute.xlu0 %338 }
  0xe1   : > { %1443 = vset.pattern.permute.xlu1 %v1781_v10 }
  0xe3   : > { %v1840_v49 = vpop.permute.xlu2 %429 }
  0xe4   : > { %v1842_v51 = vpop.permute.xlu0 %416 }
  0xeb   : > { %v455_v53 = vpop.permute.xlu2 %454  ;;  %v1848_v58 = vpop.permute.xlu1 %390 }
  0xec   : > { %v548_v54 = vmul.f32 %v455_v53, %v312_v52  ;;  %v494_v57 = vpop.permute.xlu0 %493 }
  0xed   : > { %v554_v59 = vmul.f32 %v494_v57, %v318_v55 }
  0xee   : > { %v1846_v56 = vadd.f32 %v548_v54, %v339_v48 }
  0xef   : > { %v1853_v60 = vadd.f32 %v554_v59, %v378_v37 }
  0xf0   : > { %581 = vst.msk [vmem:[%s1829_s6 + $0x8] sm:$0xff] %vm579_vm2, %v1846_v56  ;;  %v597_v32 = vsel %vm579_vm2, %v1846_v56, -inf }
  0xf1   : > { %587 = vst.msk [vmem:[%s1829_s6 + $0x38] sm:$0xff] %vm579_vm2, %v1853_v60  ;;  %v624_v22 = vsel %vm579_vm2, %v1853_v60, -inf }
  0xf3   : > { %v1860_v0 = vpop.permute.xlu1 %403 }
  0xf5   : > { %v792_v62 = vpop.permute.xlu0 %791 }
  0xf6   : > { %vm793_vm3 = vcmp.eq.s32.totalorder %v789_v61, %v792_v62  ;;  %v322_v61 = vld [vmem:[%s1768_s22 + $0x58] sm:$0xff] }
  0xf7   : > { %v1362_v4 = vsel %vm793_vm3, 1.0, %v1650_v1  ;;  %v314_v62 = vld [vmem:[%s1768_s22 + $0x18] sm:$0xff] }
  0xf8   : > { %v822_v6 = vperm.slane %v1362_v4, 2  ;;  %v835_v7 = vperm.slane %v1362_v4, 3  ;;  %v796_v8 = vperm.slane %v1362_v4, 0  ;;  %v809_v9 = vperm.slane %v1362_v4, 1 }
  0xf9   : > { %v848_v15 = vperm.slane %v1362_v4, 4  ;;  %v861_v16 = vperm.slane %v1362_v4, 5  ;;  %v874_v40 = vperm.slane %v1362_v4, 6  ;;  %v887_v41 = vperm.slane %v1362_v4, 7 }
  0xfa   : > { %v1450_v12 = vpack.i.bf16 %v835_v7, %v822_v6  ;;  %v1444_v13 = vpack.i.bf16 %v809_v9, %v796_v8 }
  0xfb   : > { %v475_v5 = vpop.permute.xlu2 %474  ;;  %v1460_v20 = vpack.i.bf16 %v861_v16, %v848_v15 }
  0xfc   : > { %v551_v11 = vmul.f32 %v475_v5, %v315_v63  ;;  %1451 = vperm.xlu2 %1449, %v1450_v12   ;;  %1445 = vperm.xlu1 %1443, %v1444_v13  }
  0xfd   : > { %1439 = vperm.xlu0 %1437, %v1444_v13  }
  0xfe   : > { %v1862_v14 = vadd.f32 %v551_v11, %v359_v31 }
 0x100   : > { %584 = vst.msk [vmem:[%s1829_s6 + $0x20] sm:$0xff] %vm579_vm2, %v1862_v14 }
 0x103   : > { %v488_v17 = vpop.permute.xlu2 %487  ;;  %v1868_v18 = vpop.permute.xlu1 %423 }
 0x104   : > { %v553_v19 = vmul.f32 %v488_v17, %v317_v2  ;;  %1461 = vperm.xlu2 %1449, %v1460_v20   ;;  %1456 = vperm.xlu1 %1443, %v1450_v12   ;;  %v605_v12 = vsel %vm579_vm2, %v1825_v45, -inf  ;;  %v324_v2 = vld [vmem:[%s1768_s22 + $0x68] sm:$0xff] }
 0x105   : > { %1465 = vset.pattern.permute.xlu0 %v1781_v10  ;;  %v316_v17 = vld [vmem:[%s1768_s22 + $0x28] sm:$0xff] }
 0x106   : > { %v569_v21 = vadd.f32 %v553_v19, %v372_v50  ;;  %v1478_v50 = vpack.i.bf16 %v887_v41, %v874_v40 }
 0x108   : > { %586 = vst.msk [vmem:[%s1829_s6 + $0x30] sm:$0xff] %vm579_vm2, %v569_v21  ;;  %v623_v23 = vsel %vm579_vm2, %v569_v21, -inf }
 0x109   : > { %v625_v24 = vmax.f32 %v623_v23, %v624_v22 }
 0x10b   : > { %v626_v26 = vrot.slane %v625_v24, 4  ;;  %v449_v27 = vpop.permute.xlu1 %448 }
 0x10c   : > { %v547_v28 = vmul.f32 %v449_v27, %v311_v25  ;;  %1477 = vset.pattern.permute.xlu2 %v1781_v10  ;;  %1471 = vset.pattern.permute.xlu1 %v1775_v3 }
 0x10d   : > { %v627_v29 = vmax.f32 %v625_v24, %v626_v26  ;;  %1467 = vperm.xlu0 %1465, %v1460_v20  }
 0x10e   : > { %v563_v30 = vadd.f32 %v547_v28, %v1815_v34 }
 0x10f   : > { %v628_v31 = vrot.slane %v627_v29, 2 }
 0x110   : > { %580 = vst.msk [vmem:[%s1829_s6] sm:$0xff] %vm579_vm2, %v563_v30  ;;  %v596_v35 = vsel %vm579_vm2, %v563_v30, -inf }
 0x111   : > { %v629_v36 = vmax.f32 %v627_v29, %v628_v31  ;;  %v598_v37 = vmax.f32 %v596_v35, %v597_v32  ;;  %v614_v31 = vsel %vm579_vm2, %v1862_v14, -inf }
 0x113   : > { %v630_v34 = vrot.slane %v629_v36, 1  ;;  %v599_v43 = vrot.slane %v598_v37, 4  ;;  %v507_v10 = vpop.permute.xlu2 %506 }
 0x114   : > { %v556_v3 = vmul.f32 %v507_v10, %v320_v39  ;;  %1479 = vperm.xlu2 %1477, %v1478_v50   ;;  %1473 = vperm.xlu1 %1471, %v1478_v50  }
 0x115   : > { %v631_v44 = vmax.f32 %v629_v36, %v630_v34  ;;  %v600_v48 = vmax.f32 %v598_v37, %v599_v43 }
 0x116   : > { %v1887_v52 = vadd.f32 %v556_v3, %v1848_v58 }
 0x117   : > { %v674_v53 = vsub.f32 %v569_v21, %v631_v44  ;;  %v675_v54 = vsub.f32 %v1853_v60, %v631_v44  ;;  %v601_v55 = vrot.slane %v600_v48, 2 }
 0x118   : > { %589 = vst.msk [vmem:[%s1829_s6 + $0x48] sm:$0xff] %vm579_vm2, %v1887_v52 }
 0x119   : > { %v696_v57 = vmul.f32 1.442695, %v674_v53  ;;  %v602_v59 = vmax.f32 %v600_v48, %v601_v55  ;;  %v698_v63 = vmul.f32 1.442695, %v675_v54 }
 0x11b   : > { %1485 = vpow2.f32 %v696_v57  ;;  %v603_v1 = vrot.slane %v602_v59, 1  ;;  %v520_v58 = vpop.permute.xlu2 %519  ;;  %v468_v4 = vpop.permute.xlu1 %467 }
 0x11c   : > { %v558_v5 = vmul.f32 %v520_v58, %v322_v61  ;;  %v550_v60 = vmul.f32 %v468_v4, %v314_v62  ;;  %1487 = vpow2.f32 %v698_v63  ;;  %v319_v61 = vld [vmem:[%s1768_s22 + $0x40] sm:$0xff] }
 0x11d   : > { %v604_v6 = vmax.f32 %v602_v59, %v603_v1 }
 0x11e   : > { %v1896_v7 = vadd.f32 %v558_v5, %v1860_v0  ;;  %v566_v8 = vadd.f32 %v550_v60, %v1837_v47 }
 0x11f   : > { %v668_v9 = vsub.f32 %v563_v30, %v604_v6  ;;  %v669_v11 = vsub.f32 %v1846_v56, %v604_v6 }
 0x120   : > { %591 = vst.msk [vmem:[%s1829_s6 + $0x58] sm:$0xff] %vm579_vm2, %v1896_v7  ;;  %v606_v13 = vsel %vm579_vm2, %v566_v8, -inf }
 0x121   : > { %v1907_v15 = vpop.eup %1485  ;;  %v684_v16 = vmul.f32 1.442695, %v668_v9  ;;  %583 = vst.msk [vmem:[%s1829_s6 + $0x18] sm:$0xff] %vm579_vm2, %v566_v8  ;;  %v607_v0 = vmax.f32 %v605_v12, %v606_v13  ;;  %v686_v47 = vmul.f32 1.442695, %v669_v11 }
 0x122   : > { %v1912_v19 = vpop.eup %1487  ;;  %v743_v56 = vsel %vm579_vm2, %v1907_v15, 0.0 }
 0x123   : > { %1489 = vpow2.f32 %v684_v16  ;;  %v608_v20 = vrot.slane %v607_v0, 4  ;;  %v533_v21 = vpop.permute.xlu2 %532  ;;  %v481_v22 = vpop.permute.xlu1 %480  ;;  %v744_v23 = vsel %vm579_vm2, %v1912_v19, 0.0 }
 0x124   : > { %v560_v24 = vmul.f32 %v533_v21, %v324_v2  ;;  %v552_v25 = vmul.f32 %v481_v22, %v316_v17  ;;  %1491 = vpow2.f32 %v686_v47  ;;  %v745_v26 = vadd.f32 %v744_v23, %v743_v56 }
 0x125   : > { %v609_v27 = vmax.f32 %v607_v0, %v608_v20 }
 0x126   : > { %v1919_v28 = vadd.f32 %v560_v24, %v1842_v51  ;;  %v568_v29 = vadd.f32 %v552_v25, %v1813_v33  ;;  %v326_v51 = vld [vmem:[%s1768_s22 + $0x78] sm:$0xff]  ;;  %v746_v58 = vrot.slane %v745_v26, 4 }
 0x127   : > { %v610_v30 = vrot.slane %v609_v27, 2 }
 0x128   : > { %593 = vst.msk [vmem:[%s1829_s6 + $0x68] sm:$0xff] %vm579_vm2, %v1919_v28  ;;  %v615_v32 = vsel %vm579_vm2, %v568_v29, -inf  ;;  %v747_v6 = vadd.f32 %v746_v58, %v745_v26 }
 0x129   : > { %v1928_v35 = vpop.eup %1489  ;;  %v611_v36 = vmax.f32 %v609_v27, %v610_v30  ;;  %585 = vst.msk [vmem:[%s1829_s6 + $0x28] sm:$0xff] %vm579_vm2, %v568_v29  ;;  %v616_v37 = vmax.f32 %v614_v31, %v615_v32  ;;  %v642_v27 = vsel %vm579_vm2, %v1896_v7, -inf }
 0x12a   : > { %v1933_v39 = vpop.eup %1491  ;;  %v716_v33 = vsel %vm579_vm2, %v1928_v35, 0.0  ;;  %v748_v20 = vrot.slane %v747_v6, 2 }
 0x12b   : > { %v612_v40 = vrot.slane %v611_v36, 1  ;;  %v617_v41 = vrot.slane %v616_v37, 4  ;;  %v546_v34 = vpop.permute.xlu2 %545  ;;  %v717_v43 = vsel %vm579_vm2, %v1933_v39, 0.0 }
 0x12c   : > { %v562_v10 = vmul.f32 %v546_v34, %v326_v51  ;;  %v718_v3 = vadd.f32 %v717_v43, %v716_v33 }
 0x12d   : > { %v613_v44 = vmax.f32 %v611_v36, %v612_v40  ;;  %v618_v48 = vmax.f32 %v616_v37, %v617_v41  ;;  %v749_v36 = vadd.f32 %v748_v20, %v747_v6 }
 0x12e   : > { %v1940_v50 = vadd.f32 %v562_v10, %v1840_v49  ;;  %v719_v11 = vrot.slane %v718_v3, 4 }
 0x12f   : > { %v670_v53 = vsub.f32 %v1825_v45, %v613_v44  ;;  %v671_v54 = vsub.f32 %v566_v8, %v613_v44  ;;  %v619_v55 = vrot.slane %v618_v48, 2  ;;  %v633_v8 = vsel %vm579_vm2, %v1887_v52, -inf }
 0x130   : > { %595 = vst.msk [vmem:[%s1829_s6 + $0x78] sm:$0xff] %vm579_vm2, %v1940_v50  ;;  %v720_v22 = vadd.f32 %v719_v11, %v718_v3 }
 0x131   : > { %v690_v57 = vmul.f32 1.442695, %v671_v54  ;;  %v620_v59 = vmax.f32 %v618_v48, %v619_v55  ;;  %v688_v62 = vmul.f32 1.442695, %v670_v53  ;;  %v750_v55 = vrot.slane %v749_v36, 1 }
 0x132   : > { %v721_v32 = vrot.slane %v720_v22, 2 }
 0x133   : > { %1493 = vpow2.f32 %v690_v57  ;;  %v621_v63 = vrot.slane %v620_v59, 1  ;;  %v501_v1 = vpop.permute.xlu1 %500 }
 0x134   : > { %v555_v4 = vmul.f32 %v501_v1, %v319_v61  ;;  %1495 = vpow2.f32 %v688_v62  ;;  %v722_v54 = vadd.f32 %v721_v32, %v720_v22  ;;  %v651_v1 = vsel %vm579_vm2, %v1919_v28, -inf }
 0x135   : > { %v622_v49 = vmax.f32 %v620_v59, %v621_v63 }
 0x136   : > { %v1948_v45 = vadd.f32 %v555_v4, %v1819_v38  ;;  %v321_v38 = vld [vmem:[%s1768_s22 + $0x50] sm:$0xff]  ;;  %v723_v6 = vrot.slane %v722_v54, 1 }
 0x137   : > { %v672_v5 = vsub.f32 %v1862_v14, %v622_v49  ;;  %v673_v60 = vsub.f32 %v568_v29, %v622_v49 }
 0x138   : > { %588 = vst.msk [vmem:[%s1829_s6 + $0x40] sm:$0xff] %vm579_vm2, %v1948_v45  ;;  %v632_v9 = vsel %vm579_vm2, %v1948_v45, -inf }
 0x139   : > { %v1958_v12 = vpop.eup %1493  ;;  %v694_v13 = vmul.f32 1.442695, %v673_v60  ;;  %v634_v2 = vmax.f32 %v632_v9, %v633_v8  ;;  %v692_v16 = vmul.f32 1.442695, %v672_v5 }
 0x13a   : > { %v1961_v0 = vpop.eup %1495  ;;  %v726_v14 = vsel %vm579_vm2, %v1958_v12, 0.0 }
 0x13b   : > { %1497 = vpow2.f32 %v694_v13  ;;  %v635_v17 = vrot.slane %v634_v2, 4  ;;  %v514_v47 = vpop.permute.xlu1 %513  ;;  %v725_v56 = vsel %vm579_vm2, %v1961_v0, 0.0  ;;  %v325_v13 = vld [vmem:[%s1768_s22 + $0x70] sm:$0xff] }
 0x13c   : > { %v557_v21 = vmul.f32 %v514_v47, %v321_v38  ;;  %1499 = vpow2.f32 %v692_v16  ;;  %v727_v23 = vadd.f32 %v726_v14, %v725_v56 }
 0x13d   : > { %v636_v24 = vmax.f32 %v634_v2, %v635_v17  ;;  %v2001_v17 = vadd.f32 %v723_v6, %v722_v54 }
 0x13e   : > { %v1968_v25 = vadd.f32 %v557_v21, %v1823_v42  ;;  %v728_v26 = vrot.slane %v727_v23, 4  ;;  %v323_v42 = vld [vmem:[%s1768_s22 + $0x60] sm:$0xff] }
 0x13f   : > { %v637_v29 = vrot.slane %v636_v24, 2  ;;  %vm993_vm10 = vweird.f32 %v2001_v17 }
 0x140   : > { %590 = vst.msk [vmem:[%s1829_s6 + $0x50] sm:$0xff] %vm579_vm2, %v1968_v25  ;;  %v641_v30 = vsel %vm579_vm2, %v1968_v25, -inf  ;;  %v729_v31 = vadd.f32 %v728_v26, %v727_v23 }
 0x141   : > { %v1977_v37 = vpop.eup %1497  ;;  %v638_v51 = vmax.f32 %v636_v24, %v637_v29  ;;  %v643_v33 = vmax.f32 %v641_v30, %v642_v27  ;;  %v660_v29 = vsel %vm579_vm2, %v1940_v50, -inf }
 0x142   : > { %v1980_v40 = vpop.eup %1499  ;;  %v735_v41 = vsel %vm579_vm2, %v1977_v37, 0.0  ;;  %v730_v34 = vrot.slane %v729_v31, 2 }
 0x143   : > { %v639_v43 = vrot.slane %v638_v51, 1  ;;  %v644_v10 = vrot.slane %v643_v33, 4  ;;  %v527_v3 = vpop.permute.xlu1 %526  ;;  %v734_v44 = vsel %vm579_vm2, %v1980_v40, 0.0 }
 0x144   : > { %v559_v48 = vmul.f32 %v527_v3, %v323_v42  ;;  %v736_v53 = vadd.f32 %v735_v41, %v734_v44  ;;  %v731_v63 = vadd.f32 %v730_v34, %v729_v31 }
 0x145   : > { %v640_v57 = vmax.f32 %v638_v51, %v639_v43  ;;  %v645_v59 = vmax.f32 %v643_v33, %v644_v10 }
 0x146   : > { %v1987_v61 = vadd.f32 %v559_v48, %v1834_v46  ;;  %v737_v62 = vrot.slane %v736_v53, 4  ;;  %v1998_v46 = vadd.f32 %v750_v55, %v749_v36  ;;  %v732_v38 = vrot.slane %v731_v63, 1 }
 0x147   : > { %v676_v58 = vsub.f32 %v1948_v45, %v640_v57  ;;  %v677_v4 = vsub.f32 %v1887_v52, %v640_v57  ;;  %v646_v49 = vrot.slane %v645_v59, 2 }
 0x148   : > { %592 = vst.msk [vmem:[%s1829_s6 + $0x60] sm:$0xff] %vm579_vm2, %v1987_v61  ;;  %v650_v5 = vsel %vm579_vm2, %v1987_v61, -inf  ;;  %v738_v60 = vadd.f32 %v737_v62, %v736_v53  ;;  %v2007_v22 = vadd.f32 %v732_v38, %v731_v63  ;;  %vm1038_vm4 = vweird.f32 %v1998_v46 }
 0x149   : > { %v700_v8 = vmul.f32 1.442695, %v676_v58  ;;  %v647_v9 = vmax.f32 %v645_v59, %v646_v49  ;;  %v652_v11 = vmax.f32 %v650_v5, %v651_v1  ;;  %v702_v2 = vmul.f32 1.442695, %v677_v4 }
 0x14a   : > { %v739_v20 = vrot.slane %v738_v60, 2  ;;  %vm1008_vm13 = vweird.f32 %v2007_v22 }
 0x14b   : > { %1501 = vpow2.f32 %v700_v8  ;;  %v648_v45 = vrot.slane %v647_v9, 1  ;;  %v653_v52 = vrot.slane %v652_v11, 4  ;;  %v540_v16 = vpop.permute.xlu1 %539 }
 0x14c   : > { %v561_v14 = vmul.f32 %v540_v16, %v325_v13  ;;  %1503 = vpow2.f32 %v702_v2  ;;  %v740_v27 = vadd.f32 %v739_v20, %v738_v60 }
 0x14d   : > { %v649_v47 = vmax.f32 %v647_v9, %v648_v45  ;;  %v654_v56 = vmax.f32 %v652_v11, %v653_v52  ;;  %1505 = vrcp.f32 %v1998_v46 }
 0x14e   : > { %v2005_v21 = vadd.f32 %v561_v14, %v1868_v18  ;;  %1507 = vrcp.f32 %v2001_v17  ;;  %v741_v33 = vrot.slane %v740_v27, 1 }
 0x14f   : > { %v678_v23 = vsub.f32 %v1968_v25, %v649_v47  ;;  %v679_v24 = vsub.f32 %v1896_v7, %v649_v47  ;;  %v655_v26 = vrot.slane %v654_v56, 2  ;;  %1509 = vrcp.f32 %v2007_v22 }
 0x150   : > { %594 = vst.msk [vmem:[%s1829_s6 + $0x70] sm:$0xff] %vm579_vm2, %v2005_v21  ;;  %v659_v30 = vsel %vm579_vm2, %v2005_v21, -inf  ;;  %v2032_v54 = vadd.f32 %v741_v33, %v740_v27 }
 0x151   : > { %v2019_v18 = vpop.eup %1501  ;;  %v704_v31 = vmul.f32 1.442695, %v678_v23  ;;  %v656_v32 = vmax.f32 %v654_v56, %v655_v26  ;;  %v661_v25 = vmax.f32 %v659_v30, %v660_v29  ;;  %v706_v36 = vmul.f32 1.442695, %v679_v24 }
 0x152   : > { %v2021_v7 = vpop.eup %1503  ;;  %v752_v51 = vsel %vm579_vm2, %v2019_v18, 0.0  ;;  %v1042_v24 = vand.u32 2147483647, %v1998_v46  ;;  %vm1023_vm0 = vweird.f32 %v2032_v54 }
 0x153   : > { %v2026_v42 = vpop.eup %1505  ;;  %1511 = vpow2.f32 %v704_v31  ;;  %v657_v41 = vrot.slane %v656_v32, 1  ;;  %v662_v34 = vrot.slane %v661_v25, 4  ;;  %v753_v43 = vsel %vm579_vm2, %v2021_v7, 0.0 }
 0x154   : > { %1513 = vpow2.f32 %v706_v36  ;;  %v754_v10 = vadd.f32 %v753_v43, %v752_v51  ;;  %v2030_v48 = vpop.eup %1507  ;;  %v1034_v55 = vmul.f32 %v2026_v42, %v1998_v46  ;;  %vm1039_vm5 = vweird.f32 %v2026_v42 }
 0x155   : > { %v658_v3 = vmax.f32 %v656_v32, %v657_v41  ;;  %v663_v44 = vmax.f32 %v661_v25, %v662_v34  ;;  %v2038_v63 = vpop.eup %1509  ;;  %1515 = vrcp.f32 %v2032_v54  ;;  %v989_v9 = vmul.f32 %v2030_v48, %v2001_v17  ;;  %vm2085_vm7 = vmor %vm1038_vm4, %vm1039_vm5 }
 0x156   : > { %v755_v53 = vrot.slane %v754_v10, 4  ;;  %v1035_v8 = vsub.f32 1.0, %v1034_v55  ;;  %v1004_v2 = vmul.f32 %v2038_v63, %v2007_v22  ;;  %v2058_v20 = vpop.permute.xlu2 %1451  ;;  %v1044_v34 = vand.u32 2147483648, %v1998_v46 }
 0x157   : > { %v680_v57 = vsub.f32 %v1987_v61, %v658_v3  ;;  %v681_v59 = vsub.f32 %v1919_v28, %v658_v3  ;;  %v664_v62 = vrot.slane %v663_v44, 2  ;;  %v990_v14 = vsub.f32 1.0, %v989_v9 }
 0x158   : > { %v756_v6 = vadd.f32 %v755_v53, %v754_v10  ;;  %v1036_v47 = vmul.f32 %v2026_v42, %v1035_v8  ;;  %v1005_v30 = vsub.f32 1.0, %v1004_v2  ;;  %vm2077_vm6 = vcmp.eq.f32.partialorder %v1042_v24, 8.507059e+37 }
 0x159   : > { %v2040_v1 = vpop.eup %1511  ;;  %v708_v58 = vmul.f32 1.442695, %v680_v57  ;;  %v665_v4 = vmax.f32 %v663_v44, %v664_v62  ;;  %v710_v49 = vmul.f32 1.442695, %v681_v59  ;;  %v991_v36 = vmul.f32 %v2030_v48, %v990_v14 }
 0x15a   : > { %v2042_v5 = vpop.eup %1513  ;;  %v761_v60 = vsel %vm579_vm2, %v2040_v1, 0.0  ;;  %v757_v45 = vrot.slane %v756_v6, 2  ;;  %v1037_v51 = vadd.f32 %v2026_v42, %v1036_v47  ;;  %v1006_v43 = vmul.f32 %v2038_v63, %v1005_v30 }
 0x15b   : > { %1517 = vpow2.f32 %v708_v58  ;;  %v666_v61 = vrot.slane %v665_v4, 1  ;;  %v762_v28 = vsel %vm579_vm2, %v2042_v5, 0.0  ;;  %v2056_v56 = vpop.eup %1515  ;;  %v997_v53 = vand.u32 2147483647, %v2001_v17 }
 0x15c   : > { %1519 = vpow2.f32 %v710_v49  ;;  %v763_v11 = vadd.f32 %v762_v28, %v761_v60  ;;  %v758_v32 = vadd.f32 %v757_v45, %v756_v6  ;;  %v1019_v41 = vmul.f32 %v2056_v56, %v2032_v54 }
 0x15d   : > { %v667_v13 = vmax.f32 %v665_v4, %v666_v61  ;;  %v999_v55 = vand.u32 2147483648, %v2001_v17  ;;  %v1012_v62 = vand.u32 2147483647, %v2007_v22  ;;  %v992_v58 = vadd.f32 %v2030_v48, %v991_v36 }
 0x15e   : > { %v764_v38 = vrot.slane %v763_v11, 4  ;;  %v759_v59 = vrot.slane %v758_v32, 1  ;;  %vm994_vm8 = vweird.f32 %v2030_v48  ;;  %v1041_v4 = vsel %vm2085_vm7, %v2026_v42, %v1037_v51  ;;  %v1462_v9 = vpop.permute.xlu2 %1461 }
 0x15f   : > { %v682_v52 = vsub.f32 %v2005_v21, %v667_v13  ;;  %v683_v16 = vsub.f32 %v1940_v50, %v667_v13  ;;  %v1014_v49 = vand.u32 2147483648, %v2007_v22  ;;  %v1020_v60 = vsub.f32 1.0, %v1019_v41  ;;  %vm2101_vm11 = vmor %vm993_vm10, %vm994_vm8 }
 0x160   : > { %v765_v23 = vadd.f32 %v764_v38, %v763_v11  ;;  %v1045_v6 = vor.u32 1.1754944e-38, %v1044_v34  ;;  %v1007_v61 = vadd.f32 %v2038_v63, %v1006_v43  ;;  %vm1009_vm9 = vweird.f32 %v2038_v63 }
 0x161   : > { %v2061_v26 = vpop.eup %1517  ;;  %v712_v27 = vmul.f32 1.442695, %v682_v52  ;;  %v714_v29 = vmul.f32 1.442695, %v683_v16  ;;  %vm2105_vm12 = vcmp.eq.f32.partialorder %v997_v53, 8.507059e+37  ;;  %v1000_v13 = vor.u32 1.1754944e-38, %v999_v55  ;;  %vm2129_vm15 = vmor %vm1008_vm13, %vm1009_vm9 }
 0x162   : > { %v2063_v31 = vpop.eup %1519  ;;  %v770_v50 = vsel %vm579_vm2, %v2061_v26, 0.0  ;;  %v766_v21 = vrot.slane %v765_v23, 2  ;;  %v2111_v2 = vsel %vm2077_vm6, %v1045_v6, %v1041_v4  ;;  %v2113_v38 = vadd.f32 %v759_v59, %v758_v32 }
 0x163   : > { %v771_v25 = vsel %vm579_vm2, %v2063_v31, 0.0  ;;  %1521 = vpow2.f32 %v712_v27  ;;  %v1454_v17 = vunpack.i.h.bf16 %v2058_v20  ;;  %vm2119_vm14 = vcmp.eq.f32.partialorder %v1012_v62, 8.507059e+37 }
 0x164   : > { %v772_v33 = vadd.f32 %v771_v25, %v770_v50  ;;  %1523 = vpow2.f32 %v714_v29  ;;  %v767_v3 = vadd.f32 %v766_v21, %v765_v23  ;;  %v996_v16 = vsel %vm2101_vm11, %v2030_v48, %v992_v58 }
 0x165   : > { %v1453_v14 = vunpack.i.l.bf16 %v2058_v20  ;;  %v1015_v23 = vor.u32 1.1754944e-38, %v1014_v49  ;;  %v1021_v24 = vmul.f32 %v2056_v56, %v1020_v60  ;;  %v1464_v27 = vunpack.i.h.bf16 %v1462_v9 }
 0x166   : > { %v773_v44 = vrot.slane %v772_v33, 4  ;;  %v768_v46 = vrot.slane %v767_v3, 1  ;;  %v1011_v29 = vsel %vm2129_vm15, %v2038_v63, %v1007_v61  ;;  %v1027_v48 = vand.u32 2147483647, %v2032_v54 }
 0x167   : > { %v1463_v50 = vunpack.i.l.bf16 %v1462_v9  ;;  %1525 = vrcp.f32 %v2113_v38  ;;  %v906_v32 = vmul.f32 %v1907_v15, %v1454_v17  ;;  %v2148_v25 = vsel %vm2105_vm12, %v1000_v13, %v996_v16 }
 0x168   : > { %v774_v8 = vadd.f32 %v773_v44, %v772_v33  ;;  %v2134_v22 = vadd.f32 %v768_v46, %v767_v3  ;;  %v1029_v63 = vand.u32 2147483648, %v2032_v54  ;;  %v904_v36 = vmul.f32 %v1980_v40, %v1453_v14 }
 0x169   : > { %v2099_v28 = vpop.eup %1521  ;;  %v1022_v51 = vadd.f32 %v2056_v56, %v1021_v24  ;;  %vm1024_vm1 = vweird.f32 %v2056_v56  ;;  %v2158_v15 = vsel %vm2119_vm14, %v1015_v23, %v1011_v29  ;;  %vm2160_vm3 = vcmp.eq.f32.partialorder %v1027_v48, 8.507059e+37 }
 0x16a   : > { %v2115_v45 = vpop.eup %1523  ;;  %v775_v30 = vrot.slane %v774_v8, 2  ;;  %v779_v20 = vsel %vm579_vm2, %v2099_v28, 0.0  ;;  %1527 = vrcp.f32 %v2134_v22  ;;  %v910_v10 = vmul.f32 %v2040_v1, %v1464_v27  ;;  %vm2171_vm4 = vmor %vm1023_vm0, %vm1024_vm1 }
 0x16b   : > { %v780_v21 = vsel %vm579_vm2, %v2115_v45, 0.0  ;;  %v908_v40 = vmul.f32 %v2019_v18, %v1463_v50  ;;  %v943_v55 = vsel %vm579_vm2, %v906_v32, 0.0  ;;  %v1030_v58 = vor.u32 1.1754944e-38, %v1029_v63 }
 0x16c   : > { %v781_v33 = vadd.f32 %v780_v21, %v779_v20  ;;  %v776_v43 = vadd.f32 %v775_v30, %v774_v8  ;;  %v934_v18 = vsel %vm579_vm2, %v904_v36, 0.0  ;;  %v1026_v60 = vsel %vm2171_vm4, %v2056_v56, %v1022_v51 }
 0x16d   : > { %v2175_v4 = vpop.eup %1525  ;;  %v2188_v9 = vsel %vm579_vm2, %v910_v10, 0.0  ;;  %v2191_v11 = vsel %vm579_vm2, %v908_v40, 0.0  ;;  %v1059_v13 = vand.u32 2147483648, %v2113_v38  ;;  %v2202_v16 = vsel %vm2160_vm3, %v1030_v58, %v1026_v60 }
 0x16e   : > { %v1446_v41 = vpop.permute.xlu1 %1445  ;;  %v782_v6 = vrot.slane %v781_v33, 4  ;;  %v777_v8 = vrot.slane %v776_v43, 1  ;;  %v1057_v14 = vand.u32 2147483647, %v2113_v38  ;;  %v1072_v32 = vand.u32 2147483647, %v2134_v22 }
 0x16f   : > { %v1448_v3 = vunpack.i.h.bf16 %v1446_v41  ;;  %v1447_v44 = vunpack.i.l.bf16 %v1446_v41  ;;  %v1440_v53 = vpop.permute.xlu0 %1439  ;;  %v2210_v36 = vor.u32 1.1754944e-38, %v1059_v13  ;;  %vm1054_vm5 = vweird.f32 %v2175_v4 }
 0x170   : > { %v1442_v57 = vunpack.i.h.bf16 %v1440_v53  ;;  %v1441_v59 = vunpack.i.l.bf16 %v1440_v53  ;;  %v2185_v61 = vpop.eup %1527  ;;  %v783_v47 = vadd.f32 %v782_v6, %v781_v33  ;;  %v2207_v29 = vadd.f32 %v777_v8, %v776_v43 }
 0x171   : > { %v903_v1 = vmul.f32 %v1958_v12, %v1448_v3  ;;  %v901_v49 = vmul.f32 %v1933_v39, %v1447_v44  ;;  %v1480_v12 = vpop.permute.xlu2 %1479  ;;  %v1064_v27 = vmul.f32 %v2185_v61, %v2134_v22  ;;  %vm1069_vm6 = vweird.f32 %v2185_v61 }
 0x172   : > { %v902_v54 = vmul.f32 %v1961_v0, %v1442_v57  ;;  %v900_v46 = vmul.f32 %v1928_v35, %v1441_v59  ;;  %v1049_v35 = vmul.f32 %v2175_v4, %v2113_v38  ;;  %v1482_v23 = vunpack.i.h.bf16 %v1480_v12 }
 0x173   : > { %v926_v39 = vsel %vm579_vm2, %v903_v1, 0.0  ;;  %v917_v42 = vsel %vm579_vm2, %v901_v49, 0.0  ;;  %v1481_v21 = vunpack.i.l.bf16 %v1480_v12  ;;  %v1065_v43 = vsub.f32 1.0, %v1064_v27 }
 0x174   : > { %v925_v56 = vsel %vm579_vm2, %v902_v54, 0.0  ;;  %v916_v0 = vsel %vm579_vm2, %v900_v46, 0.0  ;;  %v1050_v63 = vsub.f32 1.0, %v1049_v35  ;;  %v915_v10 = vmul.f32 %v2115_v45, %v1482_v23 }
 0x175   : > { %v927_v17 = vadd.f32 %v926_v39, %v925_v56  ;;  %v918_v52 = vadd.f32 %v917_v42, %v916_v0  ;;  %1529 = vrcp.f32 %v2207_v29  ;;  %v784_v40 = vrot.slane %v783_v47, 2 }
 0x176   : > { %v1457_v24 = vpop.permute.xlu1 %1456  ;;  %v1051_v45 = vmul.f32 %v2175_v4, %v1050_v63  ;;  %v2222_v49 = vsel %vm579_vm2, %v915_v10, 0.0  ;;  %v913_v60 = vmul.f32 %v2063_v31, %v1481_v21  ;;  %vm1053_vm7 = vweird.f32 %v2113_v38 }
 0x177   : > { %v928_v48 = vrot.slane %v927_v17, 4  ;;  %v919_v30 = vrot.slane %v918_v52, 4  ;;  %v1459_v20 = vunpack.i.h.bf16 %v1457_v24  ;;  %v1458_v50 = vunpack.i.l.bf16 %v1457_v24  ;;  %vm2261_vm10 = vmor %vm1053_vm7, %vm1054_vm5 }
 0x178   : > { %v785_v1 = vadd.f32 %v784_v40, %v783_v47  ;;  %v1066_v8 = vmul.f32 %v2185_v61, %v1065_v43  ;;  %vm1068_vm8 = vweird.f32 %v2134_v22  ;;  %vm2253_vm9 = vcmp.eq.f32.partialorder %v1072_v32, 8.507059e+37 }
 0x179   : > { %v907_v51 = vmul.f32 %v1912_v19, %v1459_v20  ;;  %v905_v33 = vmul.f32 %v1977_v37, %v1458_v50  ;;  %v929_v41 = vadd.f32 %v928_v48, %v927_v17  ;;  %v920_v34 = vadd.f32 %v919_v30, %v918_v52  ;;  %vm2283_vm12 = vmor %vm1068_vm8, %vm1069_vm6 }
 0x17a   : > { %v1074_v19 = vand.u32 2147483648, %v2134_v22  ;;  %v786_v12 = vrot.slane %v785_v1, 1  ;;  %v2232_v17 = vadd.f32 %v2175_v4, %v1051_v45  ;;  %v1067_v43 = vadd.f32 %v2185_v61, %v1066_v8 }
 0x17b   : > { %v944_v3 = vsel %vm579_vm2, %v907_v51, 0.0  ;;  %v935_v44 = vsel %vm579_vm2, %v905_v33, 0.0  ;;  %v930_v53 = vrot.slane %v929_v41, 2  ;;  %v921_v57 = vrot.slane %v920_v34, 2  ;;  %v2228_v39 = vpop.eup %1529 }
 0x17c   : > { %v945_v59 = vadd.f32 %v944_v3, %v943_v55  ;;  %v936_v62 = vadd.f32 %v935_v44, %v934_v18  ;;  %v2234_v52 = vadd.f32 %v786_v12, %v785_v1  ;;  %v1079_v20 = vmul.f32 %v2228_v39, %v2207_v29 }
 0x17d   : > { %v931_v37 = vadd.f32 %v930_v53, %v929_v41  ;;  %v922_v58 = vadd.f32 %v921_v57, %v920_v34  ;;  %vm2267_vm11 = vcmp.eq.f32.partialorder %v1057_v14, 8.507059e+37  ;;  %v1056_v32 = vsel %vm2261_vm10, %v2175_v4, %v2232_v17 }
 0x17e   : > { %v946_v6 = vrot.slane %v945_v59, 4  ;;  %v937_v54 = vrot.slane %v936_v62, 4  ;;  %1531 = vrcp.f32 %v2234_v52  ;;  %vm1083_vm13 = vweird.f32 %v2207_v29 }
 0x17f   : > { %v1468_v55 = vpop.permute.xlu0 %1467  ;;  %v932_v18 = vrot.slane %v931_v37, 1  ;;  %v923_v46 = vrot.slane %v922_v58, 1  ;;  %vm1084_vm14 = vweird.f32 %v2228_v39  ;;  %vm1098_vm1 = vweird.f32 %v2234_v52 }
 0x180   : > { %v1470_v42 = vunpack.i.h.bf16 %v1468_v55  ;;  %v1469_v56 = vunpack.i.l.bf16 %v1468_v55  ;;  %v938_v0 = vadd.f32 %v937_v54, %v936_v62  ;;  %v947_v35 = vadd.f32 %v946_v6, %v945_v59  ;;  %vm2318_vm0 = vmor %vm1083_vm13, %vm1084_vm14 }
 0x181   : > { %v933_v31 = vadd.f32 %v932_v18, %v931_v37  ;;  %v924_v13 = vadd.f32 %v923_v46, %v922_v58  ;;  %v1080_v37 = vsub.f32 1.0, %v1079_v20 }
 0x182   : > { %v911_v47 = vmul.f32 %v2042_v5, %v1470_v42  ;;  %v909_v23 = vmul.f32 %v2021_v7, %v1469_v56  ;;  %v939_v24 = vrot.slane %v938_v0, 2  ;;  %v948_v27 = vrot.slane %v947_v35, 2 }
 0x183   : > { %v1017_v48 = vmul.f32 %v2158_v15, %v933_v31  ;;  %v1002_v30 = vmul.f32 %v2148_v25, %v924_v13  ;;  %v971_v25 = vsel %vm579_vm2, %v913_v60, 0.0  ;;  %v1075_v13 = vor.u32 1.1754944e-38, %v1074_v19 }
 0x184   : > { %v962_v50 = vsel %vm579_vm2, %v911_v47, 0.0  ;;  %v953_v21 = vsel %vm579_vm2, %v909_v23, 0.0  ;;  %v940_v63 = vadd.f32 %v939_v24, %v938_v0  ;;  %v949_v51 = vadd.f32 %v948_v27, %v947_v35  ;;  %v2275_v58 = vpop.eup %1531 }
 0x185   : > { %v963_v5 = vadd.f32 %v962_v50, %v2188_v9  ;;  %v954_v7 = vadd.f32 %v953_v21, %v2191_v11  ;;  %v1111_v33 = vsel %vm579_vm2, %v1017_v48, 0.0  ;;  %v1108_v15 = vsel %vm579_vm2, %v1002_v30, 0.0 }
 0x186   : > { %1112 = vadd.xlane.f32.xlu2 %v1111_v33  ;;  %1109 = vadd.xlane.f32.xlu1 %v1108_v15  ;;  %v1474_v41 = vpop.permute.xlu1 %1473  ;;  %v941_v34 = vrot.slane %v940_v63, 1  ;;  %v950_v10 = vrot.slane %v949_v51, 1  ;;  %v1087_v47 = vand.u32 2147483647, %v2207_v29  ;;  %v1061_v27 = vsel %vm2267_vm11, %v2210_v36, %v1056_v32 }
 0x187   : > { %v964_v40 = vrot.slane %v963_v5, 4  ;;  %v955_v3 = vrot.slane %v954_v7, 4  ;;  %v1476_v44 = vunpack.i.h.bf16 %v1474_v41  ;;  %v1475_v53 = vunpack.i.l.bf16 %v1474_v41 }
 0x188   : > { %v942_v59 = vadd.f32 %v941_v34, %v940_v63  ;;  %v951_v62 = vadd.f32 %v950_v10, %v949_v51  ;;  %vm1099_vm15 = vweird.f32 %v2275_v58  ;;  %v1104_v36 = vand.u32 2147483648, %v2234_v52 }
 0x189   : > { %v914_v45 = vmul.f32 %v2099_v28, %v1476_v44  ;;  %v912_v1 = vmul.f32 %v2061_v26, %v1475_v53  ;;  %v965_v60 = vadd.f32 %v964_v40, %v963_v5  ;;  %v956_v14 = vadd.f32 %v955_v3, %v954_v7  ;;  %vm1100_vm3 = vmor %vm1098_vm1, %vm1099_vm15 }
 0x18a   : > { %v1032_v6 = vmul.f32 %v2202_v16, %v942_v59  ;;  %v1047_v4 = vmul.f32 %v2111_v2, %v951_v62  ;;  %v1071_v28 = vsel %vm2283_vm12, %v2185_v61, %v1067_v43  ;;  %v1094_v26 = vmul.f32 %v2275_v58, %v2234_v52 }
 0x18b   : > { %v979_v54 = vsel %vm579_vm2, %v914_v45, 0.0  ;;  %v970_v55 = vsel %vm579_vm2, %v912_v1, 0.0  ;;  %v966_v18 = vrot.slane %v965_v60, 2  ;;  %v957_v46 = vrot.slane %v956_v14, 2 }
 0x18c   : > { %v981_v8 = vadd.f32 %v2222_v49, %v979_v54  ;;  %v972_v12 = vadd.f32 %v971_v25, %v970_v55  ;;  %v1114_v16 = vsel %vm579_vm2, %v1032_v6, 0.0  ;;  %v1117_v2 = vsel %vm579_vm2, %v1047_v4, 0.0 }
 0x18d   : > { %1115 = vadd.xlane.f32.xlu0 %v1114_v16  ;;  %v967_v42 = vadd.f32 %v966_v18, %v965_v60  ;;  %v958_v56 = vadd.f32 %v957_v46, %v956_v14  ;;  %v1081_v61 = vmul.f32 %v2228_v39, %v1080_v37  ;;  %v1095_v0 = vsub.f32 1.0, %v1094_v26 }
 0x18e   : > { %v982_v35 = vrot.slane %v981_v8, 4  ;;  %v973_v31 = vrot.slane %v972_v12, 4  ;;  %1118 = vadd.xlane.f32.xlu2 %v1117_v2  ;;  %v1076_v24 = vsel %vm2253_vm9, %v1075_v13, %v1071_v28  ;;  %v1089_v7 = vand.u32 2147483648, %v2207_v29 }
 0x18f   : > { %v968_v49 = vrot.slane %v967_v42, 1  ;;  %v959_v17 = vrot.slane %v958_v56, 1  ;;  %v1096_v23 = vmul.f32 %v2275_v58, %v1095_v0  ;;  %v1082_v19 = vadd.f32 %v2228_v39, %v1081_v61 }
 0x190   : > { %v974_v48 = vadd.f32 %v973_v31, %v972_v12  ;;  %v983_v30 = vadd.f32 %v982_v35, %v981_v8  ;;  %v1102_v41 = vand.u32 2147483647, %v2234_v52  ;;  %v1090_v44 = vor.u32 1.1754944e-38, %v1089_v7 }
 0x191   : > { %v969_v20 = vadd.f32 %v968_v49, %v967_v42  ;;  %v960_v22 = vadd.f32 %v959_v17, %v958_v56  ;;  %v1097_v63 = vadd.f32 %v2275_v58, %v1096_v23  ;;  %v1086_v29 = vsel %vm2318_vm0, %v2228_v39, %v1082_v19 }
 0x192   : > { %v975_v50 = vrot.slane %v974_v48, 2  ;;  %v984_v21 = vrot.slane %v983_v30, 2  ;;  %v1105_v53 = vor.u32 1.1754944e-38, %v1104_v36  ;;  %vm1088_vm4 = vcmp.eq.f32.partialorder %v1087_v47, 8.507059e+37 }
 0x193   : > { %v1077_v51 = vmul.f32 %v1076_v24, %v969_v20  ;;  %v1062_v5 = vmul.f32 %v1061_v27, %v960_v22  ;;  %v1101_v3 = vsel %vm1100_vm3, %v2275_v58, %v1097_v63  ;;  %vm1103_vm5 = vcmp.eq.f32.partialorder %v1102_v41, 8.507059e+37 }
 0x194   : > { %v976_v33 = vadd.f32 %v975_v50, %v974_v48  ;;  %v985_v25 = vadd.f32 %v984_v21, %v983_v30  ;;  %v1091_v11 = vsel %vm1088_vm4, %v1090_v44, %v1086_v29  ;;  %v1106_v57 = vsel %vm1103_vm5, %v1105_v53, %v1101_v3 }
 0x195   : > { %v1123_v34 = vsel %vm579_vm2, %v1077_v51, 0.0  ;;  %v1120_v10 = vsel %vm579_vm2, %v1062_v5, 0.0 }
 0x196   : > { %1124 = vadd.xlane.f32.xlu2 %v1123_v34  ;;  %1121 = vadd.xlane.f32.xlu1 %v1120_v10  ;;  %v977_v43 = vrot.slane %v976_v33, 1  ;;  %v986_v40 = vrot.slane %v985_v25, 1 }
 0x198   : > { %v978_v52 = vadd.f32 %v977_v43, %v976_v33  ;;  %v987_v9 = vadd.f32 %v986_v40, %v985_v25 }
 0x19a   : > { %v1092_v59 = vmul.f32 %v1091_v11, %v978_v52  ;;  %v1107_v62 = vmul.f32 %v1106_v57, %v987_v9 }
 0x19c   : > { %v1126_v32 = vsel %vm579_vm2, %v1092_v59, 0.0  ;;  %v1129_v39 = vsel %vm579_vm2, %v1107_v62, 0.0 }
 0x19d   : > { %1127 = vadd.xlane.f32.xlu0 %v1126_v32 }
 0x19e   : > { %1130 = vadd.xlane.f32.xlu1 %v1129_v39 }
 0x19f   : > { %1606 = shalt.err (!%p1603_p3)
}
 0x1a0   : > { %s1651_s0 = smov 128   ;;  %s1652_s5 = smov 8   ;;  %v1653_v37 = vmov 64.0   ;;  %vm1179_vm6 = vcmask 1041409   ;;  %vm1181_vm7 = vcmask 1042434   ;;  %vm1183_vm8 = vcmask 1043459  }
 0x1a1   : > { %1375 = dma.vmem_to_hbm [thread:$0]  (%p1727_p9), %s1215_s10, 2048, %s1217_s11, %s1197_s12, %s1651_s0, %s1651_s0, %s1652_s5   ;;  %1533 = vrcp.f32 %v1653_v37  ;;  %vm1185_vm9 = vcmask 1044484   ;;  %vm1187_vm10 = vcmask 1045509   ;;  %vm1189_vm11 = vcmask 1046534  }
 0x1a2   : > { %vm1191_vm12 = vcmask 1047559   ;;  %s307_s7 = scalar_lea.vmem %s2374_s4, %s1360_s23  ;;  %vm1194_vm13 = vcmask 7168  }
 0x1a7   : > { %v1534_v58 = vpop.eup %1533 }
 0x1a8   : > { %v1133_v45 = vmul.f32 64.0, %v1534_v58  ;;  %vm1137_vm2 = vweird.f32 %v1534_v58 }
 0x1aa   : > { %v1134_v1 = vsub.f32 1.0, %v1133_v45 }
 0x1ac   : > { %v1135_v60 = vmul.f32 %v1534_v58, %v1134_v1 }
 0x1ae   : > { %v1136_v38 = vadd.f32 %v1534_v58, %v1135_v60 }
 0x1b0   : > { %v1138_v6 = vsel %vm1137_vm2, %v1534_v58, %v1136_v38 }
 0x1f9   : > { %v1113_v14 = vpop.xlane.xlu2 %1112  ;;  %v1110_v4 = vpop.xlane.xlu1 %1109 }
 0x1fa   : > { %v1140_v28 = vmul.f32 %v1138_v6, %v1113_v14  ;;  %v1139_v26 = vmul.f32 %v1138_v6, %v1110_v4 }
 0x1fc   : > { %1535 = vlog2.f32 %v1140_v28 }
 0x1fd   : > { %1537 = vlog2.f32 %v1139_v26 }
 0x200   : > { %v1116_v54 = vpop.xlane.xlu0 %1115 }
 0x201   : > { %v1141_v55 = vmul.f32 %v1138_v6, %v1116_v54  ;;  %v1119_v18 = vpop.xlane.xlu2 %1118 }
 0x202   : > { %v1142_v46 = vmul.f32 %v1138_v6, %v1119_v18  ;;  %v1536_v8 = vpop.eup %1535 }
 0x203   : > { %1539 = vlog2.f32 %v1141_v55  ;;  %v1538_v2 = vpop.eup %1537  ;;  %v1150_v0 = vmul.f32 0.6931472, %v1536_v8 }
 0x204   : > { %1541 = vlog2.f32 %v1142_v46  ;;  %v1148_v35 = vmul.f32 0.6931472, %v1538_v2 }
 0x205   : > { %v1164_v17 = vsub.f32 0.0, %v1150_v0 }
 0x206   : > { %v1163_v47 = vsub.f32 0.0, %v1148_v35 }
 0x208   : > { %v1180_v50 = vsel %vm1179_vm6, %v1164_v17, %v1163_v47 }
 0x209   : > { %v1125_v12 = vpop.xlane.xlu2 %1124  ;;  %v1122_v16 = vpop.xlane.xlu1 %1121 }
 0x20a   : > { %v1144_v42 = vmul.f32 %v1138_v6, %v1125_v12  ;;  %v1143_v56 = vmul.f32 %v1138_v6, %v1122_v16  ;;  %v1540_v61 = vpop.eup %1539 }
 0x20b   : > { %v1542_v31 = vpop.eup %1541  ;;  %v1152_v13 = vmul.f32 0.6931472, %v1540_v61 }
 0x20c   : > { %1543 = vlog2.f32 %v1144_v42  ;;  %v1154_v23 = vmul.f32 0.6931472, %v1542_v31 }
 0x20d   : > { %1545 = vlog2.f32 %v1143_v56  ;;  %v1165_v30 = vsub.f32 0.0, %v1152_v13 }
 0x20e   : > { %v1166_v21 = vsub.f32 0.0, %v1154_v23 }
 0x20f   : > { %v1182_v51 = vsel %vm1181_vm7, %v1165_v30, %v1180_v50 }
 0x210   : > { %v1128_v49 = vpop.xlane.xlu0 %1127  ;;  %v1184_v36 = vsel %vm1183_vm8, %v1166_v21, %v1182_v51 }
 0x211   : > { %v1145_v24 = vmul.f32 %v1138_v6, %v1128_v49  ;;  %v1131_v27 = vpop.xlane.xlu1 %1130 }
 0x212   : > { %v1544_v48 = vpop.eup %1543  ;;  %v1146_v20 = vmul.f32 %v1138_v6, %v1131_v27 }
 0x213   : > { %v1546_v22 = vpop.eup %1545  ;;  %1547 = vlog2.f32 %v1145_v24  ;;  %v1158_v63 = vmul.f32 0.6931472, %v1544_v48 }
 0x214   : > { %v1156_v19 = vmul.f32 0.6931472, %v1546_v22  ;;  %1549 = vlog2.f32 %v1146_v20 }
 0x215   : > { %v1168_v33 = vsub.f32 0.0, %v1158_v63 }
 0x216   : > { %v1167_v5 = vsub.f32 0.0, %v1156_v19 }
 0x218   : > { %v1186_v25 = vsel %vm1185_vm9, %v1167_v5, %v1184_v36 }
 0x219   : > { %v1548_v7 = vpop.eup %1547  ;;  %v1188_v43 = vsel %vm1187_vm10, %v1168_v33, %v1186_v25 }
 0x21a   : > { %v1550_v15 = vpop.eup %1549  ;;  %v1160_v41 = vmul.f32 0.6931472, %v1548_v7 }
 0x21b   : > { %v1162_v34 = vmul.f32 0.6931472, %v1550_v15 }
 0x21c   : > { %v1169_v10 = vsub.f32 0.0, %v1160_v41 }
 0x21d   : > { %v1170_v29 = vsub.f32 0.0, %v1162_v34 }
 0x21e   : > { %v1190_v40 = vsel %vm1189_vm11, %v1169_v10, %v1188_v43 }
 0x21f   : > { %v1192_v3 = vsel %vm1191_vm12, %v1170_v29, %v1190_v40 }
 0x220   : > { %1195 = vst.msk [vmem:[%s307_s7] sm:$0xff] %vm1194_vm13, %v1192_v3 }
 0x221 PF: > { %p1381_p9 = scmp.ge.s32.totalorder %s1645_s18, 2  ;;  %s1234_s8 = sand.u32 1, %s1633_s15  }
 0x222   : > { %s1235_s26 = scalar_lea.sflag [#allocation5], %s1234_s8 }
 0x223   : > { %p1378_p4 = pnand %p1381_p9, %p1731_p10 }
 0x225   : > { %p1379_p7 = pneg %p1378_p4 }
 0x227   : > { %1628 = dma.done.wait (%p1379_p7), %s1235_s26, 2048  }
 0x228   : > { %1630 = vsyncadd (%p1379_p7), %s1235_s26, 4294965248  ;;  %p18_p8 = scmp.ge.s32.totalorder %s1704_s21, 6   ;;  %s2407_s15 = smov %s1637_s16 }
 0x229   : > { %s2408_s16 = smov %s1641_s17  ;;  %s2409_s17 = smov %s1716_s24 }
 0x22a   : > { %s2410_s18 = smov %s1704_s21  ;;  %20 = sbr.rel (!%p18_p8) target bundleno = 7 (0x7), region = 138 }
 0x22f   :  { %1248 = vsyncpa [#allocation4], 1 }
 0x230   :  { %1250 = vsyncpa [#allocation4 + $0x1], 1 }
 0x231   :  { %1251 = vsyncpa [#allocation5], 1 }
 0x232   :  { %1253 = vsyncpa [#allocation5 + $0x1], 1 }

</bundles_post_ra>
